<compile_context>
chip_gen: v7x
topology: tpu7x:2x2x1
jax: 0.10.0
libtpu: 0.0.40
codegen_flags: <defaults>
</compile_context>

<pallas_src>
import math
import functools

import jax
import jax.numpy as jnp
from jax.experimental import pallas as pl
from jax.experimental.pallas import tpu as pltpu


def mha_kernel(q_ref, k_ref, v_ref, wqkv_ref, bqkv_ref, wo_ref, o_ref, *, heads, d_k):
    """One grid step = `block_b` batch elements.

    q_ref/k_ref/v_ref : (Bt, S, D)  f32 activations
    wqkv_ref          : (3, D, D)   pre-transposed W_q/W_k/W_v (bf16); W_q row
                                    already scaled by 1/sqrt(d_k)
    bqkv_ref          : (3, 1, D)   biases (f32); b_q already scaled
    wo_ref            : (D, D)      pre-transposed output projection (bf16)
    o_ref             : (Bt, S, D)  f32 output
    """
    Bt, S, D = q_ref.shape
    rows = Bt * S
    bh = Bt * heads

    def proj(x_ref, g):
        # Lane-dense (rows, D) @ (D, D) GEMM, bf16 MXU inputs, f32 accumulation.
        x = x_ref[...].reshape(rows, D).astype(jnp.bfloat16)
        return jnp.dot(x, wqkv_ref[g], preferred_element_type=jnp.float32) + bqkv_ref[g]

    def to_heads(p):
        # (rows, D) -> (Bt*H, S, d_k): single head-split relayout (cast to bf16
        # first so the relayout moves half the bytes).
        p = p.astype(jnp.bfloat16).reshape(Bt, S, heads, d_k)
        return p.transpose(0, 2, 1, 3).reshape(bh, S, d_k)

    qh = to_heads(proj(q_ref, 0))   # 1/sqrt(d_k) folded into wqkv[0]/bqkv[0]
    kh = to_heads(proj(k_ref, 1))
    vh = to_heads(proj(v_ref, 2))

    # Scaled dot-product attention, batched over (batch, head) (bf16 MXU, f32 acc).
    s = jnp.einsum("hqd,hkd->hqk", qh, kh,
                   preferred_element_type=jnp.float32)            # (Bt*H, S, S)
    m = jnp.max(s, axis=-1, keepdims=True)
    e = jnp.exp(s - m)                                            # f32 exp (safe on v5e)
    l = jnp.sum(e, axis=-1, keepdims=True)                        # (Bt*H, S, 1)
    ctx = jnp.einsum("hqk,hkd->hqd", e.astype(jnp.bfloat16), vh,
                     preferred_element_type=jnp.float32)          # (Bt*H, S, d_k)
    ctx = ctx * pl.reciprocal(l, approx=True)                     # softmax denom on EUP

    # Output projection with the head reduction folded into the contraction:
    # (rows, H*d_k) @ (H*d_k, D), one lane-dense GEMM.
    ctx2 = (ctx.astype(jnp.bfloat16)
               .reshape(Bt, heads, S, d_k)
               .transpose(0, 2, 1, 3)
               .reshape(rows, heads * d_k))
    out = jnp.dot(ctx2, wo_ref[...], preferred_element_type=jnp.float32)
    o_ref[...] = out.reshape(Bt, S, D).astype(o_ref.dtype)


def _choose_block_b(B, S):
    """Pack batch rows per grid step (fill sublanes) while keeping >=2 parallel
    grid steps when B >= 2 (so both v7x TensorCores get work)."""
    best = 1
    for d in range(1, B + 1):
        if B % d == 0 and d * S <= 128 and (B // d >= 2 or B == 1):
            best = d
    return best


def _vmem_limit_bytes():
    """Generation-aware scoped-VMEM limit (~75% of physical: v5e/v6e 128 MiB,
    v7x 64 MiB); conservative 32 MiB fallback if the query API is unavailable."""
    try:
        cap = pltpu.get_tpu_info().vmem_capacity_bytes
        return max(32 * 1024 * 1024, int(cap) * 3 // 4)
    except Exception:
        return 32 * 1024 * 1024


def multi_headed_attention(query, key, value, params, heads, block_b=None):
    """Pallas wrapper. query/key/value: (B, S, D) float32 (equal shapes)."""
    B, S, D = query.shape
    assert key.shape == (B, S, D) and value.shape == (B, S, D)
    assert D % heads == 0
    d_k = D // heads
    wq, bq, wk, bk, wv, bv, wo = params
    inv_sqrt_dk = 1.0 / math.sqrt(d_k)

    # One-time (XLA-side) weight prep: transpose to (in, out), fold the Q scale,
    # stack into a single resident slab, cast to bf16.
    w_qkv = jnp.stack([wq.T * inv_sqrt_dk, wk.T, wv.T], axis=0).astype(jnp.bfloat16)  # (3, D, D)
    b_qkv = jnp.stack([bq * inv_sqrt_dk, bk, bv], axis=0).reshape(3, 1, D).astype(jnp.float32)
    wo_t = wo.T.astype(jnp.bfloat16)                                                  # (D, D)

    if block_b is None:
        block_b = _choose_block_b(B, S)
    assert B % block_b == 0
    grid = (B // block_b,)

    kernel = functools.partial(mha_kernel, heads=heads, d_k=d_k)

    def resident(shape):
        # Whole-array block, constant index_map: stays VMEM-resident across grid
        # steps (no re-copy).  For large D: single-buffer or keep in HBM + K-tile.
        zeros = (0,) * len(shape)
        return pl.BlockSpec(shape, lambda b, _z=zeros: _z)

    act_spec = pl.BlockSpec((block_b, S, D), lambda b: (b, 0, 0))

    return pl.pallas_call(
        kernel,
        out_shape=jax.ShapeDtypeStruct((B, S, D), jnp.float32),
        grid=grid,
        in_specs=[
            act_spec,                 # query (f32, cast in-kernel)
            act_spec,                 # key
            act_spec,                 # value
            resident((3, D, D)),      # packed W_q/W_k/W_v^T (bf16)
            resident((3, 1, D)),      # packed biases (f32)
            resident((D, D)),         # W_o^T (bf16, no bias in the module)
        ],
        out_specs=pl.BlockSpec((block_b, S, D), lambda b: (b, 0, 0)),
        compiler_params=pltpu.CompilerParams(
            dimension_semantics=("parallel",),
            vmem_limit_bytes=_vmem_limit_bytes()),
    )(query, key, value, w_qkv, b_qkv, wo_t)


def reference_mha(query, key, value, params, heads):
    """Pure-JAX float32 reference mirroring the PyTorch forward (mask=None, dropout=0)."""
    wq, bq, wk, bk, wv, bv, wo = params
    B, S, D = query.shape
    d_k = D // heads
    q = query @ wq.T + bq
    k = key @ wk.T + bk
    v = value @ wv.T + bv
    q = q.reshape(B, S, heads, d_k).transpose(0, 2, 1, 3)
    k = k.reshape(B, S, heads, d_k).transpose(0, 2, 1, 3)
    v = v.reshape(B, S, heads, d_k).transpose(0, 2, 1, 3)
    scores = jnp.einsum("bhqd,bhkd->bhqk", q, k) / math.sqrt(d_k)
    p = jax.nn.softmax(scores, axis=-1)
    out = jnp.einsum("bhqk,bhkd->bhqd", p, v)
    out = out.transpose(0, 2, 1, 3).reshape(B, S, heads * d_k)
    return out @ wo.T


if __name__ == "__main__":
    # Small shapes consistent with the module: B=2, S=8, d_model=32, heads=4
    B, S, D, H = 2, 8, 32, 4

    root = jax.random.PRNGKey(0)
    ks = jax.random.split(root, 11)
    query = jax.random.normal(ks[0], (B, S, D), dtype=jnp.float32)
    key_in = jax.random.normal(ks[1], (B, S, D), dtype=jnp.float32)
    value_in = jax.random.normal(ks[2], (B, S, D), dtype=jnp.float32)

    # Deterministic synthetic params (PyTorch Linear layout: (out, in))
    scale = 1.0 / math.sqrt(D)
    wq = jax.random.uniform(ks[3], (D, D), jnp.float32, -scale, scale)
    bq = jax.random.uniform(ks[4], (D,), jnp.float32, -scale, scale)
    wk = jax.random.uniform(ks[5], (D, D), jnp.float32, -scale, scale)
    bk = jax.random.uniform(ks[6], (D,), jnp.float32, -scale, scale)
    wv = jax.random.uniform(ks[7], (D, D), jnp.float32, -scale, scale)
    bv = jax.random.uniform(ks[8], (D,), jnp.float32, -scale, scale)
    wo = jax.random.uniform(ks[9], (D, D), jnp.float32, -scale, scale)
    params = (wq, bq, wk, bk, wv, bv, wo)

    out = multi_headed_attention(query, key_in, value_in, params, H)
    out = jax.block_until_ready(out)

    ref = reference_mha(query, key_in, value_in, params, H)
    assert out.shape == (B, S, D)
    max_err = float(jnp.max(jnp.abs(out - ref)))
    # bf16 matmuls with f32 accumulation + approx reciprocal: loosened tolerance
    # vs. the f32 reference (use approx=False / f32 MXU if bit-accuracy needed).
    assert jnp.allclose(out, ref, atol=3e-2, rtol=3e-2), (
        f"mismatch vs reference (max abs err {max_err:.4f})")

    print("KERNEL_OK")
</pallas_src>

<mosaic_0001>
module attributes {stable_mosaic.version = 11 : i64} {
  func.func @mha_kernel(%arg0: i32, %arg1: memref<1x8x32xf32, #tpu.memory_space<vmem>>, %arg2: memref<1x8x32xf32, #tpu.memory_space<vmem>>, %arg3: memref<1x8x32xf32, #tpu.memory_space<vmem>>, %arg4: memref<3x32x32xbf16, #tpu.memory_space<vmem>>, %arg5: memref<3x1x32xf32, #tpu.memory_space<vmem>>, %arg6: memref<32x32xbf16, #tpu.memory_space<vmem>>, %arg7: memref<1x8x32xf32, #tpu.memory_space<vmem>>) attributes {dimension_semantics = [#tpu.dimension_semantics<parallel>], iteration_bounds = array<i64: 2>, scalar_prefetch = 0 : i64, scratch_operands = 0 : i64, tpu.core_type = #tpu.core_type<tc>, window_params = [{transform_indices = @transform_0, window_bounds = array<i64: 1, 8, 32>}, {transform_indices = @transform_1, window_bounds = array<i64: 1, 8, 32>}, {transform_indices = @transform_2, window_bounds = array<i64: 1, 8, 32>}, {pipeline_mode = #tpu.pipeline_mode<synchronous>, transform_indices = @transform_3, window_bounds = array<i64: 3, 32, 32>}, {pipeline_mode = #tpu.pipeline_mode<synchronous>, transform_indices = @transform_4, window_bounds = array<i64: 3, 1, 32>}, {pipeline_mode = #tpu.pipeline_mode<synchronous>, transform_indices = @transform_5, window_bounds = array<i64: 32, 32>}, {transform_indices = @transform_6, window_bounds = array<i64: 1, 8, 32>}]} {
    %c0 = arith.constant 0 : index
    %c0_0 = arith.constant 0 : index
    %c0_1 = arith.constant 0 : index
    %0 = vector.load %arg1[%c0, %c0_0, %c0_1] : memref<1x8x32xf32, #tpu.memory_space<vmem>>, vector<1x8x32xf32>
    %1 = vector.shape_cast %0 : vector<1x8x32xf32> to vector<8x32xf32>
    %2 = arith.truncf %1 : vector<8x32xf32> to vector<8x32xbf16>
    %c0_2 = arith.constant 0 : index
    %c0_3 = arith.constant 0 : index
    %c0_4 = arith.constant 0 : index
    %3 = vector.load %arg4[%c0_2, %c0_3, %c0_4] : memref<3x32x32xbf16, #tpu.memory_space<vmem>>, vector<1x32x32xbf16>
    %4 = vector.shape_cast %3 : vector<1x32x32xbf16> to vector<32x32xbf16>
    %cst = arith.constant dense<0.000000e+00> : vector<8x32xf32>
    %5 = tpu.matmul %2, %4, %cst {dimension_numbers = #tpu.dot_dimension_numbers<[1], [0], [0], [1], [0, 0, 1, 1], [], []>} : vector<8x32xbf16>, vector<32x32xbf16>, vector<8x32xf32> -> vector<8x32xf32>
    %c0_5 = arith.constant 0 : index
    %c0_6 = arith.constant 0 : index
    %c0_7 = arith.constant 0 : index
    %6 = vector.load %arg5[%c0_5, %c0_6, %c0_7] : memref<3x1x32xf32, #tpu.memory_space<vmem>>, vector<1x1x32xf32>
    %7 = vector.shape_cast %6 : vector<1x1x32xf32> to vector<1x32xf32>
    %8 = vector.broadcast %7 : vector<1x32xf32> to vector<8x32xf32>
    %9 = arith.addf %5, %8 : vector<8x32xf32>
    %10 = arith.truncf %9 : vector<8x32xf32> to vector<8x32xbf16>
    %11 = vector.shape_cast %10 : vector<8x32xbf16> to vector<1x8x4x8xbf16>
    %12 = tpu.transpose %11, [0, 2, 1, 3] : vector<1x8x4x8xbf16> -> vector<1x4x8x8xbf16>
    %13 = vector.shape_cast %12 : vector<1x4x8x8xbf16> to vector<4x8x8xbf16>
    %c0_8 = arith.constant 0 : index
    %c0_9 = arith.constant 0 : index
    %c0_10 = arith.constant 0 : index
    %14 = vector.load %arg2[%c0_8, %c0_9, %c0_10] : memref<1x8x32xf32, #tpu.memory_space<vmem>>, vector<1x8x32xf32>
    %15 = vector.shape_cast %14 : vector<1x8x32xf32> to vector<8x32xf32>
    %16 = arith.truncf %15 : vector<8x32xf32> to vector<8x32xbf16>
    %c1 = arith.constant 1 : index
    %c0_11 = arith.constant 0 : index
    %c0_12 = arith.constant 0 : index
    %17 = vector.load %arg4[%c1, %c0_11, %c0_12] : memref<3x32x32xbf16, #tpu.memory_space<vmem>>, vector<1x32x32xbf16>
    %18 = vector.shape_cast %17 : vector<1x32x32xbf16> to vector<32x32xbf16>
    %cst_13 = arith.constant dense<0.000000e+00> : vector<8x32xf32>
    %19 = tpu.matmul %16, %18, %cst_13 {dimension_numbers = #tpu.dot_dimension_numbers<[1], [0], [0], [1], [0, 0, 1, 1], [], []>} : vector<8x32xbf16>, vector<32x32xbf16>, vector<8x32xf32> -> vector<8x32xf32>
    %c1_14 = arith.constant 1 : index
    %c0_15 = arith.constant 0 : index
    %c0_16 = arith.constant 0 : index
    %20 = vector.load %arg5[%c1_14, %c0_15, %c0_16] : memref<3x1x32xf32, #tpu.memory_space<vmem>>, vector<1x1x32xf32>
    %21 = vector.shape_cast %20 : vector<1x1x32xf32> to vector<1x32xf32>
    %22 = vector.broadcast %21 : vector<1x32xf32> to vector<8x32xf32>
    %23 = arith.addf %19, %22 : vector<8x32xf32>
    %24 = arith.truncf %23 : vector<8x32xf32> to vector<8x32xbf16>
    %25 = vector.shape_cast %24 : vector<8x32xbf16> to vector<1x8x4x8xbf16>
    %26 = tpu.transpose %25, [0, 2, 1, 3] : vector<1x8x4x8xbf16> -> vector<1x4x8x8xbf16>
    %27 = vector.shape_cast %26 : vector<1x4x8x8xbf16> to vector<4x8x8xbf16>
    %c0_17 = arith.constant 0 : index
    %c0_18 = arith.constant 0 : index
    %c0_19 = arith.constant 0 : index
    %28 = vector.load %arg3[%c0_17, %c0_18, %c0_19] : memref<1x8x32xf32, #tpu.memory_space<vmem>>, vector<1x8x32xf32>
    %29 = vector.shape_cast %28 : vector<1x8x32xf32> to vector<8x32xf32>
    %30 = arith.truncf %29 : vector<8x32xf32> to vector<8x32xbf16>
    %c2 = arith.constant 2 : index
    %c0_20 = arith.constant 0 : index
    %c0_21 = arith.constant 0 : index
    %31 = vector.load %arg4[%c2, %c0_20, %c0_21] : memref<3x32x32xbf16, #tpu.memory_space<vmem>>, vector<1x32x32xbf16>
    %32 = vector.shape_cast %31 : vector<1x32x32xbf16> to vector<32x32xbf16>
    %cst_22 = arith.constant dense<0.000000e+00> : vector<8x32xf32>
    %33 = tpu.matmul %30, %32, %cst_22 {dimension_numbers = #tpu.dot_dimension_numbers<[1], [0], [0], [1], [0, 0, 1, 1], [], []>} : vector<8x32xbf16>, vector<32x32xbf16>, vector<8x32xf32> -> vector<8x32xf32>
    %c2_23 = arith.constant 2 : index
    %c0_24 = arith.constant 0 : index
    %c0_25 = arith.constant 0 : index
    %34 = vector.load %arg5[%c2_23, %c0_24, %c0_25] : memref<3x1x32xf32, #tpu.memory_space<vmem>>, vector<1x1x32xf32>
    %35 = vector.shape_cast %34 : vector<1x1x32xf32> to vector<1x32xf32>
    %36 = vector.broadcast %35 : vector<1x32xf32> to vector<8x32xf32>
    %37 = arith.addf %33, %36 : vector<8x32xf32>
    %38 = arith.truncf %37 : vector<8x32xf32> to vector<8x32xbf16>
    %39 = vector.shape_cast %38 : vector<8x32xbf16> to vector<1x8x4x8xbf16>
    %40 = tpu.transpose %39, [0, 2, 1, 3] : vector<1x8x4x8xbf16> -> vector<1x4x8x8xbf16>
    %41 = vector.shape_cast %40 : vector<1x4x8x8xbf16> to vector<4x8x8xbf16>
    "tpu.trace_start"() <{level = 10 : i32, message = "hqd,hkd->hqk"}> : () -> ()
    %cst_26 = arith.constant dense<0.000000e+00> : vector<4x8x8xf32>
    %42 = tpu.matmul %13, %27, %cst_26 {dimension_numbers = #tpu.dot_dimension_numbers<[2], [2], [1], [1], [0, 0, 0, 1, 1, 1], [0], [0]>} : vector<4x8x8xbf16>, vector<4x8x8xbf16>, vector<4x8x8xf32> -> vector<4x8x8xf32>
    "tpu.trace_stop"() : () -> ()
    %cst_27 = arith.constant dense<0xFF800000> : vector<4x8xf32>
    %43 = vector.multi_reduction <maximumf>, %42, %cst_27 [2] : vector<4x8x8xf32> to vector<4x8xf32>
    %44 = vector.shape_cast %43 : vector<4x8xf32> to vector<4x8x1xf32>
    %45 = vector.broadcast %44 : vector<4x8x1xf32> to vector<4x8x8xf32>
    %46 = arith.subf %42, %45 : vector<4x8x8xf32>
    %47 = math.exp %46 : vector<4x8x8xf32>
    %cst_28 = arith.constant dense<0.000000e+00> : vector<4x8xf32>
    %48 = vector.multi_reduction <add>, %47, %cst_28 [2] : vector<4x8x8xf32> to vector<4x8xf32>
    %49 = vector.shape_cast %48 : vector<4x8xf32> to vector<4x8x1xf32>
    %50 = arith.truncf %47 : vector<4x8x8xf32> to vector<4x8x8xbf16>
    "tpu.trace_start"() <{level = 10 : i32, message = "hqk,hkd->hqd"}> : () -> ()
    %cst_29 = arith.constant dense<0.000000e+00> : vector<4x8x8xf32>
    %51 = tpu.matmul %50, %41, %cst_29 {dimension_numbers = #tpu.dot_dimension_numbers<[2], [1], [1], [2], [0, 0, 0, 1, 1, 2], [0], [0]>} : vector<4x8x8xbf16>, vector<4x8x8xbf16>, vector<4x8x8xf32> -> vector<4x8x8xf32>
    "tpu.trace_stop"() : () -> ()
    %52 = tpu.reciprocal %49 {approx = true} : vector<4x8x1xf32> -> vector<4x8x1xf32>
    %53 = vector.broadcast %52 : vector<4x8x1xf32> to vector<4x8x8xf32>
    %54 = arith.mulf %51, %53 : vector<4x8x8xf32>
    %55 = arith.truncf %54 : vector<4x8x8xf32> to vector<4x8x8xbf16>
    %56 = vector.shape_cast %55 : vector<4x8x8xbf16> to vector<1x4x8x8xbf16>
    %57 = tpu.transpose %56, [0, 2, 1, 3] : vector<1x4x8x8xbf16> -> vector<1x8x4x8xbf16>
    %58 = vector.shape_cast %57 : vector<1x8x4x8xbf16> to vector<8x32xbf16>
    %c0_30 = arith.constant 0 : index
    %c0_31 = arith.constant 0 : index
    %59 = vector.load %arg6[%c0_30, %c0_31] : memref<32x32xbf16, #tpu.memory_space<vmem>>, vector<32x32xbf16>
    %cst_32 = arith.constant dense<0.000000e+00> : vector<8x32xf32>
    %60 = tpu.matmul %58, %59, %cst_32 {dimension_numbers = #tpu.dot_dimension_numbers<[1], [0], [0], [1], [0, 0, 1, 1], [], []>} : vector<8x32xbf16>, vector<32x32xbf16>, vector<8x32xf32> -> vector<8x32xf32>
    %61 = vector.shape_cast %60 : vector<8x32xf32> to vector<1x8x32xf32>
    %c0_33 = arith.constant 0 : index
    %c0_34 = arith.constant 0 : index
    %c0_35 = arith.constant 0 : index
    %62 = vector.load %arg7[%c0_33, %c0_34, %c0_35] : memref<1x8x32xf32, #tpu.memory_space<vmem>>, vector<1x8x32xf32>
    tpu.vector_store %arg7[%c0_33, %c0_34, %c0_35], %61 {strides = array<i32>} : memref<1x8x32xf32, #tpu.memory_space<vmem>>, vector<1x8x32xf32>,
    return
  }
  func.func @transform_0(%arg0: i32) -> (i32, i32, i32) {
    %c0_i32 = arith.constant 0 : i32
    %c0_i32_0 = arith.constant 0 : i32
    %c0_i32_1 = arith.constant 0 : i32
    return %arg0, %c0_i32, %c0_i32_0 : i32, i32, i32
  }
  func.func @transform_1(%arg0: i32) -> (i32, i32, i32) {
    %c0_i32 = arith.constant 0 : i32
    %c0_i32_0 = arith.constant 0 : i32
    %c0_i32_1 = arith.constant 0 : i32
    return %arg0, %c0_i32, %c0_i32_0 : i32, i32, i32
  }
  func.func @transform_2(%arg0: i32) -> (i32, i32, i32) {
    %c0_i32 = arith.constant 0 : i32
    %c0_i32_0 = arith.constant 0 : i32
    %c0_i32_1 = arith.constant 0 : i32
    return %arg0, %c0_i32, %c0_i32_0 : i32, i32, i32
  }
  func.func @transform_3(%arg0: i32) -> (i32, i32, i32) {
    %c0_i32 = arith.constant 0 : i32
    %c0_i32_0 = arith.constant 0 : i32
    %c0_i32_1 = arith.constant 0 : i32
    %c0_i32_2 = arith.constant 0 : i32
    return %c0_i32, %c0_i32_0, %c0_i32_1 : i32, i32, i32
  }
  func.func @transform_4(%arg0: i32) -> (i32, i32, i32) {
    %c0_i32 = arith.constant 0 : i32
    %c0_i32_0 = arith.constant 0 : i32
    %c0_i32_1 = arith.constant 0 : i32
    %c0_i32_2 = arith.constant 0 : i32
    return %c0_i32, %c0_i32_0, %c0_i32_1 : i32, i32, i32
  }
  func.func @transform_5(%arg0: i32) -> (i32, i32) {
    %c0_i32 = arith.constant 0 : i32
    %c0_i32_0 = arith.constant 0 : i32
    %c0_i32_1 = arith.constant 0 : i32
    return %c0_i32, %c0_i32_0 : i32, i32
  }
  func.func @transform_6(%arg0: i32) -> (i32, i32, i32) {
    %c0_i32 = arith.constant 0 : i32
    %c0_i32_0 = arith.constant 0 : i32
    %c0_i32_1 = arith.constant 0 : i32
    return %arg0, %c0_i32, %c0_i32_0 : i32, i32, i32
  }
}

</mosaic_0001>

<bundles_post_ra>
// kernel: tpu_custom_call.1
= control target key start
LH: loop header
LB: loop body
LE: loop exit
PB: predicated region body
PF: predicated region fallthrough
CT: control target
= control target key end

     0   :  { %s2908_s0 = inlined_call_operand.hbm [shape: f32[2,8,32], index: 0, kind: input, shape index: {}]   ;;  %s2909_s1 = inlined_call_operand.hbm [shape: f32[2,8,32], index: 1, kind: input, shape index: {}]   ;;  %s2910_s2 = inlined_call_operand.hbm [shape: f32[2,8,32], index: 2, kind: input, shape index: {}]   ;;  %s2911_s3 = inlined_call_operand.hbm [shape: bf16[3,32,32], index: 3, kind: input, shape index: {}]   ;;  %s2912_s4 = inlined_call_operand.hbm [shape: f32[3,1,32], index: 4, kind: input, shape index: {}]   ;;  %s2913_s5 = inlined_call_operand.vmem [shape: bf16[32,32], index: 5, kind: input, shape index: {}]   ;;  %s2914_s6 = inlined_call_operand.hbm [shape: f32[2,8,32], index: 6, kind: output, shape index: {}]  }
   0x1   :  { %2931 = sst [smem:[#allocation20_spill]] %s2909_s1 }
   0x2   :  { %2932 = sst [smem:[#allocation21_spill]] %s2911_s3 }
   0x3   :  { %11 = vsyncpa [#allocation3], 0 }
   0x4   :  { %13 = vsyncpa [#allocation3 + $0x1], 0 }
   0x5   :  { %14 = vsyncpa [#allocation6], 0 }
   0x6   :  { %16 = vsyncpa [#allocation6 + $0x1], 0 }
   0x7   :  { %17 = vsyncpa [#allocation9], 0 }
   0x8   :  { %18 = vsyncpa [#allocation4], 0 }
   0x9   :  { %20 = vsyncpa [#allocation4 + $0x1], 0  ;;  %s2431_s21 = smov 0   ;;  %s2433_s22 = smov 0  }
   0xa   :  { %s2435_s23 = smov 0   ;;  %s2437_s24 = smov 0  }
   0xb LB: > { %2933 = sst [smem:[#allocation16_spill]] %s2373_s24  ;;  %s2452_s25 = sadd.s32 4294967295, %s2373_s24   ;;  %s2373_s24 = sphi %s2437_s24, %s2963_s24   ;;  %s2369_s23 = sphi %s2435_s23, %s2967_s23   ;;  %s2365_s22 = sphi %s2433_s22, %s2966_s22   ;;  %s2361_s21 = sphi %s2431_s21, %s2965_s21  }
   0xc   : > { %s1884_s26 = sadd.s32 4294967294, %s2373_s24   ;;  %p46_p0 = scmp.ne.s32.totalorder %s2365_s22, %s2361_s21 }
   0xd   : > { %p2915_p1 = scmp.eq.s32.totalorder %s2452_s25, 0  ;;  %p191_p3 = scmp.eq.s32.totalorder %s1884_s26, 1 }
   0xe   : > { %p1885_p5 = scmp.ge.s32.totalorder %s2373_s24, 1  ;;  %p198_p7 = scmp.lt.s32.totalorder %s2373_s24, 3 }
   0xf   : > { %p2461_p4 = por %p2915_p1, %p46_p0  ;;  %p2466_p6 = por %p191_p3, %p46_p0 }
  0x10   : > { %p2471_p8 = pnand %p1885_p5, %p198_p7  ;;  %s2375_s30 = smov [#allocation8]  }
  0x11   : > { %s2934_s27 = scalar_select %p2461_p4, 1, 0 }
  0x12   : > { %s2935_s28 = scalar_select %p2466_p6, 1, 0 }
  0x13   : > { %s2937_s29 = scalar_select %p2471_p8, 1, 0 }
  0x14   : > { %2936 = sst [smem:[#allocation17_spill]] %s2935_s28  ;;  %s210_s7 = sshll.u32 %s2375_s30, 4  ;;  %s2475_s7 = int_to_ptr.vmem [resolvable:$true] %s210_s7 }
  0x15   : > { %p2053_p9 = pneg %p2471_p8  ;;  %s2487_s9 = sadd.s32 1, %s2373_s24  }
  0x16   : > { %2939 = sst [smem:[#allocation18_spill]] %s2487_s9  ;;  %s33_s10 = sadd.s32 1, %s2369_s23 }
  0x17   : > { %p2482_p11 = pnand %p2053_p9, %p2915_p1  ;;  %s30_s11 = ssub.s32 %s2373_s24, %s2487_s9 }
  0x18   : > { %s2940_s3 = sld [smem:[#allocation21_spill]] }
  0x19   : > { %s2938_s8 = scalar_select %p2482_p11, 1, 0 }
  0x1a   : > { %p2917_p13 = pneg %p2482_p11 }
  0x1e   : > { %s2153_s14 = scalar_lea.hbm %s2940_s3, 768 }
  0x1f   : > { %p2154_p12 = scmp.ne.s32.totalorder %s2940_s3, %s2153_s14  ;;  %p2160_p5 = scmp.lt.u32.totalorder %s2153_s14, %s2940_s3 }
  0x21   : > { %p2156_p0 = pnand %p2917_p13, %p2154_p12 }
  0x23   : > { %p2157_p3 = pneg %p2156_p0 }
  0x25   : > { %p2162_p7 = pnand %p2160_p5, %p2157_p3 }
  0x27   : > { %2165 = shalt.err (!%p2162_p7)
}
  0x28   : > { %s2166_s19 = scalar_lea.vmem %s2475_s7, 768  ;;  %p2174_p2 = scmp.lt.s32.totalorder %s2475_s7, %s2475_s7 }
  0x29   : > { %p2167_p9 = scmp.ne.s32.totalorder %s2475_s7, %s2166_s19  ;;  %p2175_p12 = scmp.lt.s32.totalorder %s2166_s19, %s2166_s19 }
  0x2b   : > { %p2169_p10 = pnand %p2167_p9, %p2917_p13  ;;  %p2176_p0 = por %p2175_p12, %p2174_p2 }
  0x2d   : > { %p2170_p1 = pneg %p2169_p10 }
  0x2f   : > { %p2177_p6 = pnand %p2176_p0, %p2170_p1 }
  0x31   : > { %2180 = shalt.err (!%p2177_p6)
}
  0x32   : > { %s2376_s20 = smov 64   ;;  %s2377_s26 = smov 4  }
  0x33   : > { %2056 = dma.hbm_to_vmem [thread:$0]  (!%p2482_p11), %s2940_s3, 768, %s2475_s7, [#allocation9], %s2376_s20, %s2376_s20, %s2377_s26  }
  0x34   : > { %p31_p1 = scmp.eq.s32.totalorder %s30_s11, 0  ;;  %p40_p2 = scmp.ne.s32.totalorder %s2369_s23, %s2365_s22 }
  0x35   : > { %p41_p6 = scmp.eq.s32.totalorder %s2373_s24, 0  ;;  %p2076_p10 = scmp.lt.s32.totalorder %s2373_s24, 2 }
  0x36   : > { %s2524_s13 = scalar_select %p31_p1, %s2369_s23, %s33_s10  }
  0x37   : > { %p42_p3 = por %p41_p6, %p40_p2  ;;  %p2942_p5 = scmp.eq.s32.totalorder %s2452_s25, 1 }
  0x38   : > { %2941 = sst [smem:[#allocation19_spill]] %s2524_s13  ;;  %s2916_s15 = sand.u32 1, %s2369_s23  }
  0x39   : > { %p2528_p7 = por %p2942_p5, %p40_p2  ;;  %s2534_s16 = sshll.u32 %s2373_s24, 7 }
  0x3a   : > { %s2538_s17 = sshll.u32 %s2916_s15, 3  ;;  %p2540_p9 = pnand %p2076_p10, %p42_p3 }
  0x3b   : > { %s2943_s14 = scalar_select %p2528_p7, 1, 0 }
  0x3c   : > { %s2944_s7 = scalar_select %p2540_p9, 1, 0 }
  0x3d   : > { %s258_s10 = sand.u32 1, %s2373_s24   ;;  %s2945_s1 = sld [smem:[#allocation20_spill]] }
  0x3e   : > { %s262_s20 = scalar_lea.vmem [#allocation5], %s2538_s17  ;;  %s2554_s30 = scalar_lea.sflag [#allocation6], %s258_s10 }
  0x3f   : > { %s269_s26 = sshll.u32 %s262_s20, 4  ;;  %p2560_p0 = pneg %p2540_p9  ;;  %s2552_s26 = int_to_ptr.vmem [resolvable:$true] %s269_s26 }
  0x41   : > { %s2946_s15 = scalar_select %p2560_p0, 1, 0 }
  0x43   : > { %s2549_s19 = scalar_lea.hbm %s2945_s1, %s2534_s16  ;;  %s2186_s3 = scalar_lea.hbm %s2945_s1, 256 }
  0x44   : > { %s2181_s12 = scalar_lea.hbm %s2549_s19, 128  ;;  %p2187_p6 = scmp.lt.u32.totalorder %s2549_s19, %s2945_s1 }
  0x45   : > { %p2182_p12 = scmp.ne.s32.totalorder %s2549_s19, %s2181_s12  ;;  %p2188_p10 = scmp.lt.u32.totalorder %s2186_s3, %s2181_s12 }
  0x46   : > { %p2190_p5 = scmp.lt.u32.totalorder %s2181_s12, %s2549_s19 }
  0x47   : > { %p2184_p1 = pnand %p2560_p0, %p2182_p12  ;;  %p2189_p3 = por %p2188_p10, %p2187_p6 }
  0x49   : > { %p2185_p2 = pneg %p2184_p1  ;;  %p2191_p13 = por %p2190_p5, %p2189_p3 }
  0x4b   : > { %p2192_p7 = pnand %p2191_p13, %p2185_p2 }
  0x4d   : > { %2195 = shalt.err (!%p2192_p7)
}
  0x4e   : > { %s2196_s10 = scalar_lea.vmem %s2552_s26, 128  ;;  %s2378_s11 = smov [#allocation5]  }
  0x4f   : > { %p2197_p12 = scmp.ne.s32.totalorder %s2552_s26, %s2196_s10  ;;  %s2201_s18 = sshll.u32 %s2378_s11, 4  ;;  %s2202_s18 = int_to_ptr.vmem [resolvable:$false] %s2201_s18 }
  0x50   : > { %s2203_s13 = scalar_lea.vmem %s2202_s18, 256  ;;  %p2204_p8 = scmp.lt.s32.totalorder %s2552_s26, %s2202_s18 }
  0x51   : > { %p2199_p1 = pnand %p2197_p12, %p2560_p0  ;;  %p2205_p11 = scmp.lt.s32.totalorder %s2203_s13, %s2196_s10 }
  0x53   : > { %p2200_p4 = pneg %p2199_p1  ;;  %p2206_p6 = por %p2205_p11, %p2204_p8 }
  0x55   : > { %p2207_p10 = pnand %p2206_p6, %p2200_p4 }
  0x57   : > { %2210 = shalt.err (!%p2207_p10)
}
  0x58   : > { %2066 = dma.hbm_to_vmem [thread:$0]  (!%p2540_p9), %s2549_s19, 128, %s2552_s26, %s2554_s30  }
  0x59   : > { %s2379_s3 = smov [#allocation10]   ;;  %s2211_s11 = scalar_lea.hbm %s2912_s4, 48 }
  0x5a   : > { %s223_s12 = sshll.u32 %s2379_s3, 4  ;;  %p2212_p8 = scmp.ne.s32.totalorder %s2912_s4, %s2211_s11  ;;  %s224_s12 = int_to_ptr.vmem [resolvable:$true] %s223_s12 }
  0x5b   : > { %p2947_p4 = scmp.ne.s32.totalorder %s2938_s8, 0  ;;  %p2218_p2 = scmp.lt.u32.totalorder %s2211_s11, %s2912_s4 }
  0x5d   : > { %p2948_p11 = pneg %p2947_p4 }
  0x5f   : > { %p2214_p13 = pnand %p2212_p8, %p2948_p11 }
  0x61   : > { %p2215_p7 = pneg %p2214_p13 }
  0x63   : > { %p2220_p3 = pnand %p2218_p2, %p2215_p7 }
  0x65   : > { %2223 = shalt.err (!%p2220_p3)
}
  0x66   : > { %s2224_s19 = scalar_lea.vmem %s224_s12, 48  ;;  %p2949_p12 = pmov %p2948_p11 }
  0x67   : > { %p2225_p5 = scmp.ne.s32.totalorder %s224_s12, %s2224_s19  ;;  %s2231_s1 = scalar_lea.vmem %s224_s12, 64 }
  0x68   : > { %p2232_p10 = scmp.lt.s32.totalorder %s224_s12, %s224_s12  ;;  %p2233_p9 = scmp.lt.s32.totalorder %s2231_s1, %s2224_s19 }
  0x69   : > { %p2227_p1 = pnand %p2225_p5, %p2949_p12 }
  0x6a   : > { %p2234_p0 = por %p2233_p9, %p2232_p10 }
  0x6b   : > { %p2228_p6 = pneg %p2227_p1 }
  0x6d   : > { %p2235_p8 = pnand %p2234_p0, %p2228_p6 }
  0x6f   : > { %2238 = shalt.err (!%p2235_p8)
}
  0x70   : > { %s2380_s9 = smov 16   ;;  %s2381_s26 = smov 1  }
  0x71   : > { %2059 = dma.hbm_to_vmem [thread:$0]  (!%p2947_p4), %s2912_s4, 48, %s224_s12, [#allocation9], %s2380_s9, %s2380_s9, %s2381_s26  }
  0x72   : > { %s2608_s10 = scalar_lea.hbm %s2908_s0, %s2534_s16  ;;  %s244_s13 = scalar_lea.vmem [#allocation2], %s2538_s17 }
  0x73   : > { %s251_s19 = sshll.u32 %s244_s13, 4  ;;  %s2950_s1 = sand.u32 1, %s2369_s23   ;;  %s252_s19 = int_to_ptr.vmem [resolvable:$true] %s251_s19 }
  0x74   : > { %s241_s24 = scalar_lea.sflag [#allocation3], %s2950_s1  ;;  %s2239_s28 = scalar_lea.hbm %s2608_s10, 128 }
  0x75   : > { %p2240_p9 = scmp.ne.s32.totalorder %s2608_s10, %s2239_s28  ;;  %p2951_p0 = scmp.ne.s32.totalorder %s2946_s15, 0 }
  0x76   : > { %s2244_s9 = scalar_lea.hbm %s2908_s0, 256  ;;  %p2245_p4 = scmp.lt.u32.totalorder %s2608_s10, %s2908_s0 }
  0x77   : > { %p2242_p11 = pnand %p2240_p9, %p2951_p0  ;;  %p2246_p7 = scmp.lt.u32.totalorder %s2244_s9, %s2239_s28 }
  0x78   : > { %p2248_p3 = scmp.lt.u32.totalorder %s2239_s28, %s2608_s10 }
  0x79   : > { %p2243_p13 = pneg %p2242_p11  ;;  %p2247_p2 = por %p2246_p7, %p2245_p4 }
  0x7b   : > { %p2249_p5 = por %p2248_p3, %p2247_p2 }
  0x7d   : > { %p2250_p12 = pnand %p2249_p5, %p2243_p13 }
  0x7f   : > { %2253 = shalt.err (!%p2250_p12)
}
  0x80   : > { %s2254_s20 = scalar_lea.vmem %s252_s19, 128  ;;  %s2382_s11 = smov [#allocation2]  }
  0x81   : > { %p2255_p1 = scmp.ne.s32.totalorder %s252_s19, %s2254_s20  ;;  %s2259_s18 = sshll.u32 %s2382_s11, 4  ;;  %s2260_s18 = int_to_ptr.vmem [resolvable:$false] %s2259_s18 }
  0x82   : > { %s2261_s13 = scalar_lea.vmem %s2260_s18, 256  ;;  %p2262_p8 = scmp.lt.s32.totalorder %s252_s19, %s2260_s18 }
  0x83   : > { %p2257_p6 = pnand %p2255_p1, %p2951_p0  ;;  %p2263_p9 = scmp.lt.s32.totalorder %s2261_s13, %s2254_s20 }
  0x85   : > { %p2258_p10 = pneg %p2257_p6  ;;  %p2264_p11 = por %p2263_p9, %p2262_p8 }
  0x87   : > { %p2265_p4 = pnand %p2264_p11, %p2258_p10 }
  0x89   : > { %2268 = shalt.err (!%p2265_p4)
}
  0x8a   : > { %p2952_p7 = scmp.ne.s32.totalorder %s2944_s7, 0  ;;  %s2634_s8 = scalar_lea.hbm %s2910_s2, %s2534_s16 }
  0x8b   : > { %s280_s12 = scalar_lea.vmem [#allocation7], %s2538_s17  ;;  %s2269_s26 = scalar_lea.hbm %s2634_s8, 128 }
  0x8c   : > { %2063 = dma.hbm_to_vmem [thread:$0]  (!%p2952_p7), %s2608_s10, 128, %s252_s19, %s241_s24  }
  0x8d   : > { %s287_s9 = sshll.u32 %s280_s12, 4  ;;  %p2270_p13 = scmp.ne.s32.totalorder %s2634_s8, %s2269_s26  ;;  %s288_s9 = int_to_ptr.vmem [resolvable:$true] %s287_s9 }
  0x8e   : > { %s2274_s24 = scalar_lea.hbm %s2910_s2, 256  ;;  %p2275_p5 = scmp.lt.u32.totalorder %s2634_s8, %s2910_s2 }
  0x8f   : > { %p2272_p2 = pnand %p2270_p13, %p2951_p0  ;;  %p2276_p12 = scmp.lt.u32.totalorder %s2274_s24, %s2269_s26 }
  0x90   : > { %p2278_p6 = scmp.lt.u32.totalorder %s2269_s26, %s2634_s8 }
  0x91   : > { %p2273_p3 = pneg %p2272_p2  ;;  %p2277_p1 = por %p2276_p12, %p2275_p5 }
  0x93   : > { %p2279_p10 = por %p2278_p6, %p2277_p1 }
  0x95   : > { %p2280_p8 = pnand %p2279_p10, %p2273_p3 }
  0x97   : > { %2283 = shalt.err (!%p2280_p8)
}
  0x98   : > { %s2284_s16 = scalar_lea.vmem %s288_s9, 128  ;;  %s2383_s17 = smov [#allocation7]  }
  0x99   : > { %p2285_p9 = scmp.ne.s32.totalorder %s288_s9, %s2284_s16  ;;  %s2289_s11 = sshll.u32 %s2383_s17, 4  ;;  %s2290_s11 = int_to_ptr.vmem [resolvable:$false] %s2289_s11 }
  0x9a   : > { %s2291_s18 = scalar_lea.vmem %s2290_s11, 256  ;;  %p2292_p13 = scmp.lt.s32.totalorder %s288_s9, %s2290_s11 }
  0x9b   : > { %p2287_p11 = pnand %p2285_p9, %p2951_p0  ;;  %p2293_p2 = scmp.lt.s32.totalorder %s2291_s18, %s2284_s16 }
  0x9d   : > { %p2288_p4 = pneg %p2287_p11  ;;  %p2294_p7 = por %p2293_p2, %p2292_p13 }
  0x9f   : > { %p2295_p5 = pnand %p2294_p7, %p2288_p4 }
  0xa1   : > { %2298 = shalt.err (!%p2295_p5)
}
  0xa2   : > { %p2953_p12 = scmp.ne.s32.totalorder %s2944_s7, 0  ;;  %p2954_p3 = scmp.ne.s32.totalorder %s2937_s29, 0 }
  0xa3   : > { %s2658_s15 = sand.u32 (!%p2954_p3), 1, %s2365_s22   ;;  %p2955_p0 = scmp.ne.s32.totalorder (!%p2954_p3), %s2934_s27, 0 }
  0xa4   : > { %2069 = dma.hbm_to_vmem [thread:$0]  (!%p2953_p12), %s2634_s8, 128, %s288_s9, %s2554_s30  }
  0xa5   : > { %296 = sbr.rel (%p2954_p3) target bundleno = 1572 (0x624), region = 44  ;;  %s2661_s13 = sshll.u32 (!%p2954_p3), %s2658_s15, 3 }
  0xa6   : > { %s299_s28 = scalar_lea.sflag (!%p2954_p3), [#allocation3], %s2658_s15  ;;  %s302_s1 = scalar_lea.vmem (!%p2954_p3), [#allocation2], %s2661_s13 }
  0xac   : > { %2344 = dma.done.wait (%p2955_p0), %s299_s28, 128  }
  0xad   : > { %2346 = vsyncadd (%p2955_p0), %s299_s28, 4294967168  ;;  %s307_s29 = sand.u32 1, %s2452_s25   ;;  %s311_s30 = scalar_lea.vmem [#allocation5], %s2661_s13 }
  0xae   : > { %s308_s7 = scalar_lea.sflag [#allocation6], %s307_s29 }
  0xaf   : > { %2348 = dma.done.wait (%p2955_p0), %s308_s7, 256  }
  0xb0   : > { %2350 = vsyncadd (%p2955_p0), %s308_s7, 4294967040  ;;  %s320_s8 = scalar_lea.vmem [#allocation7], %s2661_s13  ;;  %p2956_p7 = scmp.eq.s32.totalorder %s2452_s25, 0 }
  0xb2   : > { %2352 = dma.done.wait (%p2956_p7), [#allocation9], 816   ;;  %p2957_p1 = pmov %p2956_p7 }
  0xb3   : > { %v2384_v0 = vmov 0.0   ;;  %vm2385_vm0 = vmmov 0   ;;  %v2129_v1 = vld [vmem:[#allocation8 + $0x10] sm:$0xff]   ;;  %v2130_v2 = vld [vmem:[#allocation8] sm:$0xff]   ;;  %v2131_v3 = vld [vmem:[#allocation8 + $0x18] sm:$0xff]   ;;  %vm393_vm1 = vcmask 261120   ;;  %v448_v29 = vlaneseq }
  0xb4   : > { %2354 = vsyncadd (%p2957_p1), [#allocation9], 4294966480  ;;  %1965 = vmatprep.subr.bf16.mxu1 %v2384_v0  ;;  %1957 = vmatprep.subr.bf16.mxu0 %v2384_v0  ;;  %v606_v4 = vld [vmem:[%s311_s30] sm:$0xff]  ;;  %v368_v6 = vld [vmem:[%s302_s1] sm:$0xff]  ;;  %s2386_s27 = smov 104   ;;  %s2387_s12 = smov 120  }
  0xb5   : > { %1969 = vmatprep.mubr.msk.bf16.mxu1 %vm2385_vm0, %v2384_v0  ;;  %1961 = vmatprep.mubr.msk.bf16.mxu0 %vm2385_vm0, %v2384_v0  ;;  %v2132_v5 = vld [vmem:[#allocation8 + $0x8] sm:$0xff]   ;;  %v607_v7 = vpack.c.bf16 %v606_v4, %v606_v4  ;;  %v369_v8 = vpack.c.bf16 %v368_v6, %v368_v6  ;;  %v2133_v9 = vld [vmem:[#allocation8 + $0x20] sm:$0xff]   ;;  %v845_v11 = vld [vmem:[%s320_s8] sm:$0xff]  ;;  %s2388_s9 = smov 112   ;;  %v2389_v27 = vmov 1983009808  }
  0xb6   : > { %1966 = vmatpush3.bf16.msra.mxu1 %v2129_v1  ;;  %1958 = vmatpush3.bf16.msra.mxu0 %v2130_v2  ;;  %v2134_v10 = vld [vmem:[#allocation8 + $0x28] sm:$0xff]   ;;  %v846_v12 = vpack.c.bf16 %v845_v11, %v845_v11  ;;  %v1906_v13 = vld [vmem:[#allocation10 + $0x1] ss:$0 sm:$0xff]  ;;  %v1902_v14 = vld [vmem:[#allocation10] ss:$0 sm:$0xff]  ;;  %v446_v28 = vunpack.c.l.s4 %v2389_v27  ;;  %v449_v33 = vshrl.u32 %v448_v29, 7 }
  0xb7   : > { %1967 = vmatprep.subr.bf16.mxu1 %v2384_v0  ;;  %1959 = vmatprep.subr.bf16.mxu0 %v2384_v0  ;;  %v2390_v30 = vmov 1934713408   ;;  %v2391_v49 = vmov 0   ;;  %vm1084_vm2 = vcmask 64512   ;;  %vm1312_vm3 = vcmask 1043456   ;;  %s2392_s10 = smov 8  }
  0xb8   : > { %v463_v31 = vunpack.c.l.s4 %v2390_v30  ;;  %v447_v32 = vunpack.c.0.s8 %v446_v28  ;;  %s2393_s19 = smov 16   ;;  %s2394_s16 = smov 24   ;;  %vm1673_vm4 = vcmask 130048   ;;  %vm1676_vm5 = vcmask 195584  }
  0xb9   : > { %s1926_s17 = sshll.u32 %s2452_s25, 7  ;;  %s366_s11 = scalar_lea.vmem [#allocation11], %s2661_s13 }
  0xba   : > { %1968 = vmatpush3.bf16.msra.mxu1 %v2131_v3  ;;  %1960 = vmatpush3.bf16.msra.mxu0 %v2132_v5  ;;  %v464_v34 = vunpack.c.0.s8 %v463_v31  ;;  %v2709_v35 = vsub.s32 %v447_v32, %v449_v33  ;;  %s1752_s18 = sshll.u32 %s366_s11, 4  ;;  %s2863_s29 = scalar_lea.hbm %s2914_s6, %s1926_s17  ;;  %s2865_s18 = int_to_ptr.vmem [resolvable:$true] %s1752_s18 }
  0xbb   : > { %1981 = vmatprep.subr.bf16.mxu1 %v2384_v0  ;;  %1973 = vmatprep.subr.bf16.mxu0 %v2384_v0  ;;  %s1739_s7 = scalar_lea.sflag [#allocation4], %s2658_s15  ;;  %s2299_s30 = scalar_lea.vmem %s2865_s18, 128 }
  0xbc   : > { %v2712_v39 = vsub.s32 %v464_v34, %v449_v33  ;;  %p2300_p6 = scmp.ne.s32.totalorder %s2865_s18, %s2299_s30  ;;  %p2958_p10 = scmp.ne.s32.totalorder %s2943_s14, 0 }
  0xbd   : > { %1970 = vmatmul.mubr.msk.bf16.vlgmr.msra.gmra.mrb[0].mxu1 %vm393_vm1, %v607_v7  ;;  %1962 = vmatmul.mubr.msk.bf16.vlgmr.msra.gmra.mrb[0].mxu0 %vm393_vm1, %v369_v8  ;;  %s2395_s25 = smov [#allocation11]  }
  0xbe   : > { %1983 = vmatprep.mubr.msk.bf16.mxu1 %vm2385_vm0, %v2384_v0  ;;  %1977 = vmatprep.mubr.msk.bf16.mxu0 %vm2385_vm0, %v2384_v0  ;;  %p2301_p8 = pnand %p2300_p6, %p2958_p10  ;;  %s2303_s13 = sshll.u32 %s2395_s25, 4  ;;  %s2304_s13 = int_to_ptr.vmem [resolvable:$false] %s2303_s13 }
  0xbf   : > { %1974 = vmatpush3.bf16.msra.mxu0 %v2133_v9  ;;  %s2305_s8 = scalar_lea.vmem %s2304_s13, 256  ;;  %p2306_p11 = scmp.lt.s32.totalorder %s2865_s18, %s2304_s13 }
  0xc0   : > { %1975 = vmatprep.subr.bf16.mxu0 %v2384_v0  ;;  %p2302_p9 = pneg %p2301_p8  ;;  %p2307_p4 = scmp.lt.s32.totalorder %s2305_s8, %s2299_s30 }
  0xc2   : > { %p2308_p13 = por %p2307_p4, %p2306_p11 }
  0xc3   : > { %1976 = vmatpush3.bf16.msra.mxu0 %v2134_v10 }
  0xc4   : > { %1987 = vmatprep.subr.bf16.mxu0 %v2384_v0  ;;  %p2309_p2 = pnand %p2308_p13, %p2302_p9 }
  0xc6   : > { %1978 = vmatmul.mubr.msk.bf16.vlgmr.msra.gmra.mrb[4].mxu0 %vm393_vm1, %v846_v12 }
  0xc7   : > { %1989 = vmatprep.mubr.msk.bf16.mxu0 %vm2385_vm0, %v2384_v0 }
 0x190   : > { %v670_v15 = vpop.f32.mrb[0].mxu1  ;;  %v431_v18 = vpop.f32.mrb[0].mxu0 }
 0x191   : > { %v671_v16 = vadd.f32 %v1906_v13, %v670_v15  ;;  %v1971_v17 = vpop.f32.mrb[1].mxu1  ;;  %v432_v20 = vadd.f32 %v1902_v14, %v431_v18  ;;  %v1963_v21 = vpop.f32.mrb[1].mxu0 }
 0x192   : > { %v673_v19 = vpop.f32.mrb[2].mxu1  ;;  %v434_v24 = vpop.f32.mrb[2].mxu0 }
 0x193   : > { %v676_v22 = vpack.c.bf16 %v671_v16, %v671_v16  ;;  %v1972_v23 = vpop.f32.mrb[3].mxu1  ;;  %v1964_v25 = vpop.f32.mrb[3].mxu0  ;;  %v437_v26 = vpack.c.bf16 %v432_v20, %v432_v20 }
 0x195   : > { %682 = vrot.lane.b32.xlu1 %v676_v22, %s2386_s27  ;;  %678 = vrot.lane.b32.xlu0 %v676_v22, %s2387_s12  ;;  %v690_v48 = vrot.slane %v676_v22, %v2709_v35  ;;  %v451_v56 = vrot.slane %v437_v26, %v2709_v35 }
 0x199   : > { %680 = vrot.lane.b32.xlu0 %v676_v22, %s2388_s9  ;;  %439 = vrot.lane.b32.xlu1 %v437_v26, %s2387_s12 }
 0x19d   : > { %441 = vrot.lane.b32.xlu0 %v437_v26, %s2388_s9  ;;  %443 = vrot.lane.b32.xlu1 %v437_v26, %s2386_s27 }
 0x207   : > { %v683_v36 = vpop.permute.xlu1 %682  ;;  %v679_v37 = vpop.permute.xlu0 %678 }
 0x208   : > { %v732_v38 = vrot.slane %v683_v36, %v2709_v35  ;;  %v724_v40 = vrot.slane %v679_v37, %v2709_v35 }
 0x20a   : > { %v733_v41 = vcombine.low %v724_v40, %v732_v38  ;;  %v734_v42 = vcombine.high %v724_v40, %v732_v38 }
 0x20b   : > { %v681_v43 = vpop.permute.xlu0 %680  ;;  %v440_v44 = vpop.permute.xlu1 %439 }
 0x20c   : > { %v741_v45 = vrot.slane %v733_v41, %v2712_v39  ;;  %v748_v46 = vrot.slane %v734_v42, %v2712_v39  ;;  %v698_v47 = vrot.slane %v681_v43, %v2709_v35  ;;  %v485_v52 = vrot.slane %v440_v44, %v2709_v35 }
 0x20e   : > { %v749_v50 = vcombine.high %v741_v45, %v2391_v49  ;;  %v750_v51 = vcombine.high %v748_v46, %v2391_v49  ;;  %v699_v53 = vcombine.low %v690_v48, %v698_v47  ;;  %v700_v54 = vcombine.high %v690_v48, %v698_v47 }
 0x20f   : > { %v442_v55 = vpop.permute.xlu0 %441  ;;  %v444_v57 = vpop.permute.xlu1 %443  ;;  %v756_v58 = vshrl.u32 %v741_v45, 16  ;;  %v772_v59 = vshrl.u32 %v748_v46, 16 }
 0x210   : > { %v459_v60 = vrot.slane %v442_v55, %v2709_v35  ;;  %v493_v61 = vrot.slane %v444_v57, %v2709_v35  ;;  %v764_v62 = vshrl.u32 %v749_v50, 16  ;;  %v780_v63 = vshrl.u32 %v750_v51, 16 }
 0x211   : > { %v707_v1 = vrot.slane %v699_v53, %v2712_v39  ;;  %v714_v2 = vrot.slane %v700_v54, %v2712_v39 }
 0x212   : > { %v460_v3 = vcombine.low %v451_v56, %v459_v60  ;;  %v461_v4 = vcombine.high %v451_v56, %v459_v60  ;;  %v494_v5 = vcombine.low %v485_v52, %v493_v61  ;;  %v495_v6 = vcombine.high %v485_v52, %v493_v61 }
 0x213   : > { %v715_v7 = vcombine.high %v707_v1, %v2391_v49  ;;  %v716_v8 = vcombine.high %v714_v2, %v2391_v49  ;;  %v753_v9 = vpack.i.b16 %v741_v45, %v707_v1  ;;  %v755_v10 = vshrl.u32 %v707_v1, 16 }
 0x214   : > { %v769_v11 = vpack.i.b16 %v748_v46, %v714_v2  ;;  %v771_v12 = vshrl.u32 %v714_v2, 16  ;;  %v468_v13 = vrot.slane %v460_v3, %v2712_v39  ;;  %v475_v14 = vrot.slane %v461_v4, %v2712_v39 }
 0x215   : > { %v757_v15 = vpack.i.b16 %v756_v58, %v755_v10  ;;  %v761_v16 = vpack.i.b16 %v749_v50, %v715_v7  ;;  %v763_v17 = vshrl.u32 %v715_v7, 16  ;;  %v777_v18 = vpack.i.b16 %v750_v51, %v716_v8 }
 0x216   : > { %v773_v19 = vpack.i.b16 %v772_v59, %v771_v12  ;;  %v779_v20 = vshrl.u32 %v716_v8, 16  ;;  %v783_v21 = vcombine.low %v753_v9, %v769_v11  ;;  %v476_v22 = vcombine.high %v468_v13, %v2391_v49 }
 0x217   : > { %v765_v23 = vpack.i.b16 %v764_v62, %v763_v17  ;;  %v791_v24 = vcombine.low %v761_v16, %v777_v18  ;;  %v477_v25 = vcombine.high %v475_v14, %v2391_v49  ;;  %v516_v29 = vshrl.u32 %v468_v13, 16 }
 0x218   : > { %v781_v26 = vpack.i.b16 %v780_v63, %v779_v20  ;;  %v790_v27 = vrot.slane %v783_v21, %v2709_v35  ;;  %v808_v28 = vcombine.low %v757_v15, %v773_v19  ;;  %v524_v30 = vshrl.u32 %v476_v22, 16 }
 0x219   : > { %v532_v31 = vshrl.u32 %v475_v14, 16  ;;  %v502_v32 = vrot.slane %v494_v5, %v2712_v39  ;;  %v509_v33 = vrot.slane %v495_v6, %v2712_v39  ;;  %v540_v36 = vshrl.u32 %v477_v25, 16 }
 0x21a   : > { %v816_v34 = vcombine.low %v765_v23, %v781_v26  ;;  %v798_v37 = vrot.slane %v791_v24, %v2709_v35  ;;  %v815_v38 = vrot.slane %v808_v28, %v2709_v35 }
 0x21b   : > { %v510_v40 = vcombine.high %v502_v32, %v2391_v49  ;;  %v511_v41 = vcombine.high %v509_v33, %v2391_v49  ;;  %v514_v42 = vpack.i.b16 %v502_v32, %v468_v13  ;;  %v517_v43 = vshrl.u32 %v502_v32, 16 }
 0x21c   : > { %v530_v44 = vpack.i.b16 %v509_v33, %v475_v14  ;;  %v533_v45 = vshrl.u32 %v509_v33, 16  ;;  %v799_v46 = vcombine.low %v790_v27, %v798_v37  ;;  %v823_v47 = vrot.slane %v816_v34, %v2709_v35  ;;  %v1910_v33 = vld [vmem:[#allocation10 + $0x2] ss:$0 sm:$0xff]  ;;  %v909_v34 = vpop.f32.mrb[4].mxu0 }
 0x21d   : > { %v518_v48 = vpack.i.b16 %v517_v43, %v516_v29  ;;  %v522_v50 = vpack.i.b16 %v510_v40, %v476_v22  ;;  %v525_v51 = vshrl.u32 %v510_v40, 16  ;;  %v538_v52 = vpack.i.b16 %v511_v41, %v477_v25  ;;  %v1979_v37 = vpop.f32.mrb[5].mxu0 }
 0x21e   : > { %v534_v53 = vpack.i.b16 %v533_v45, %v532_v31  ;;  %v541_v54 = vshrl.u32 %v511_v41, 16  ;;  %v544_v55 = vcombine.low %v514_v42, %v530_v44  ;;  %v806_v56 = vrot.slane %v799_v46, %v2712_v39 }
 0x21f   : > { %v526_v57 = vpack.i.b16 %v525_v51, %v524_v30  ;;  %v552_v58 = vcombine.low %v522_v50, %v538_v52  ;;  %v824_v59 = vcombine.low %v815_v38, %v823_v47  ;;  %v912_v38 = vpop.f32.mrb[6].mxu0 }
 0x220   : > { %v542_v60 = vpack.i.b16 %v541_v54, %v540_v36  ;;  %v569_v61 = vcombine.low %v518_v48, %v534_v53  ;;  %v551_v62 = vrot.slane %v544_v55, %v2709_v35  ;;  %v836_v3 = vshrl.u32 %v806_v56, 16  ;;  %v1980_v41 = vpop.f32.mrb[7].mxu0 }
 0x221   : > { %v559_v63 = vrot.slane %v552_v58, %v2709_v35  ;;  %v831_v1 = vrot.slane %v824_v59, %v2712_v39  ;;  %v807_v12 = vcombine.high %v806_v56, %v2391_v49  ;;  %v910_v36 = vadd.f32 %v1910_v33, %v909_v34 }
 0x222   : > { %v577_v2 = vcombine.low %v526_v57, %v542_v60  ;;  %v576_v8 = vrot.slane %v569_v61, %v2709_v35 }
 0x223   : > { %v560_v4 = vcombine.low %v551_v62, %v559_v63  ;;  %v835_v5 = vpack.i.b16 %v831_v1, %v806_v56  ;;  %v837_v6 = vshrl.u32 %v831_v1, 16  ;;  %v832_v7 = vcombine.high %v831_v1, %v2391_v49 }
 0x224   : > { %v584_v9 = vrot.slane %v577_v2, %v2709_v35  ;;  %v842_v19 = vshrl.u32 %v807_v12, 16  ;;  %v915_v40 = vpack.c.bf16 %v910_v36, %v910_v36 }
 0x225   : > { %v1089_v10 = vsel %vm1084_vm2, %v835_v5, 0  ;;  %v838_v11 = vpack.i.b16 %v837_v6, %v836_v3  ;;  %v567_v15 = vrot.slane %v560_v4, %v2712_v39  ;;  %v843_v16 = vshrl.u32 %v832_v7, 16 }
 0x226   : > { %v585_v13 = vcombine.low %v576_v8, %v584_v9  ;;  %1982 = vmatpush3.bf16.xpose.msra.mxu1 %v1089_v10  ;;  %v841_v18 = vpack.i.b16 %v832_v7, %v807_v12  ;;  %917 = vrot.lane.b32.xlu0 %v915_v40, %s2387_s12  ;;  %v929_v10 = vrot.slane %v915_v40, %v2709_v35 }
 0x227   : > { %v1135_v14 = vsel %vm1084_vm2, %v838_v11, 0  ;;  %1993 = vmatprep.subr.bf16.mxu1 %v2384_v0  ;;  %v597_v22 = vshrl.u32 %v567_v15, 16  ;;  %v844_v23 = vpack.i.b16 %v843_v16, %v842_v19  ;;  %v568_v28 = vcombine.high %v567_v15, %v2391_v49 }
 0x228   : > { %1988 = vmatpush3.bf16.xpose.msra.mxu0 %v1135_v14  ;;  %v592_v17 = vrot.slane %v585_v13, %v2712_v39  ;;  %v1181_v24 = vsel %vm1084_vm2, %v841_v18, 0 }
 0x229   : > { %1999 = vmatprep.subr.bf16.mxu0 %v2384_v0  ;;  %v1227_v27 = vsel %vm1084_vm2, %v844_v23, 0  ;;  %v603_v31 = vshrl.u32 %v568_v28, 16 }
 0x22a   : > { %v598_v20 = vshrl.u32 %v592_v17, 16  ;;  %v596_v21 = vpack.i.b16 %v592_v17, %v567_v15  ;;  %v593_v26 = vcombine.high %v592_v17, %v2391_v49 }
 0x22c   : > { %v599_v25 = vpack.i.b16 %v598_v20, %v597_v22  ;;  %v604_v29 = vshrl.u32 %v593_v26, 16  ;;  %v602_v30 = vpack.i.b16 %v593_v26, %v568_v28 }
 0x22d   : > { %1984 = vmatmul.mubr.msk.bf16.vlgmr.msra.gmra.mrb[4].mxu1 %vm1084_vm2, %v596_v21 }
 0x22e   : > { %1994 = vmatpush3.bf16.xpose.msra.mxu1 %v1181_v24  ;;  %1995 = vmatprep.mubr.msk.bf16.mxu1 %vm2385_vm0, %v2384_v0  ;;  %v605_v32 = vpack.i.b16 %v604_v29, %v603_v31 }
 0x22f   : > { %1990 = vmatmul.mubr.msk.bf16.vlgmr.msra.gmra.mrb[8].mxu0 %vm1084_vm2, %v599_v25  ;;  %2005 = vmatprep.subr.bf16.mxu1 %v2384_v0 }
 0x230   : > { %2000 = vmatpush3.bf16.xpose.msra.mxu0 %v1227_v27  ;;  %2001 = vmatprep.mubr.msk.bf16.mxu0 %vm2385_vm0, %v2384_v0 }
 0x231   : > { %2011 = vmatprep.subr.bf16.mxu0 %v2384_v0 }
 0x235   : > { %1996 = vmatmul.mubr.msk.bf16.vlgmr.msra.gmra.mrb[8].mxu1 %vm1084_vm2, %v602_v30 }
 0x236   : > { %2007 = vmatprep.mubr.msk.bf16.mxu1 %vm2385_vm0, %v2384_v0 }
 0x237   : > { %2002 = vmatmul.mubr.msk.bf16.vlgmr.msra.gmra.mrb[12].mxu0 %vm1084_vm2, %v605_v32 }
 0x238   : > { %2013 = vmatprep.mubr.msk.bf16.mxu0 %vm2385_vm0, %v2384_v0 }
 0x298   : > { %v918_v63 = vpop.permute.xlu0 %917 }
 0x299   : > { %v963_v7 = vrot.slane %v918_v63, %v2709_v35 }
 0x300   : > { %v1125_v42 = vpop.f32.mrb[4].mxu1 }
 0x301   : > { %v1985_v43 = vpop.f32.mrb[5].mxu1  ;;  %v1269_v44 = vsel %vm1084_vm2, %v1125_v42, -inf }
 0x302   : > { %v1128_v45 = vpop.f32.mrb[6].mxu1  ;;  %1270 = vmax.xlane.f32.xlu0 %v1269_v44  ;;  %v1171_v46 = vpop.f32.mrb[8].mxu0 }
 0x303   : > { %v1986_v47 = vpop.f32.mrb[7].mxu1  ;;  %v1991_v48 = vpop.f32.mrb[9].mxu0  ;;  %v1272_v50 = vsel %vm1084_vm2, %v1171_v46, -inf }
 0x304   : > { %1273 = vmax.xlane.f32.xlu1 %v1272_v50  ;;  %v1174_v51 = vpop.f32.mrb[10].mxu0 }
 0x305   : > { %v1992_v52 = vpop.f32.mrb[11].mxu0 }
 0x308   : > { %v2776_v53 = vpop.f32.mrb[8].mxu1 }
 0x309   : > { %v1997_v54 = vpop.f32.mrb[9].mxu1  ;;  %v1275_v62 = vsel %vm1084_vm2, %v2776_v53, -inf }
 0x30a   : > { %v1220_v55 = vpop.f32.mrb[10].mxu1  ;;  %v2778_v56 = vpop.f32.mrb[12].mxu0 }
 0x30b   : > { %v1998_v57 = vpop.f32.mrb[11].mxu1  ;;  %v2003_v58 = vpop.f32.mrb[13].mxu0  ;;  %v1278_v61 = vsel %vm1084_vm2, %v2778_v56, -inf }
 0x30c   : > { %v1266_v59 = vpop.f32.mrb[14].mxu0 }
 0x30d   : > { %v2004_v60 = vpop.f32.mrb[15].mxu0 }
 0x315   : > { %919 = vrot.lane.b32.xlu1 %v915_v40, %s2388_s9 }
 0x318   : > { %921 = vrot.lane.b32.xlu0 %v915_v40, %s2386_s27 }
 0x337   : > { %1279 = vmax.xlane.f32.xlu0 %v1278_v61 }
 0x339   : > { %1276 = vmax.xlane.f32.xlu1 %v1275_v62 }
 0x38f   : > { %v1271_v1 = vpop.xlane.xlu0 %1270 }
 0x390   : > { %v1281_v2 = vsub.f32 %v1125_v42, %v1271_v1 }
 0x391   : > { %v1274_v3 = vpop.xlane.xlu1 %1273 }
 0x392   : > { %v1285_v4 = vmul.f32 1.442695, %v1281_v2  ;;  %v1282_v5 = vsub.f32 %v1171_v46, %v1274_v3 }
 0x393   : > { %v922_v6 = vpop.permute.xlu0 %921 }
 0x394   : > { %2137 = vpow2.f32 %v1285_v4  ;;  %v1287_v8 = vmul.f32 1.442695, %v1282_v5  ;;  %v971_v9 = vrot.slane %v922_v6, %v2709_v35 }
 0x395   : > { %v920_v11 = vpop.permute.xlu1 %919 }
 0x396   : > { %2139 = vpow2.f32 %v1287_v8  ;;  %v972_v12 = vcombine.low %v963_v7, %v971_v9  ;;  %v973_v13 = vcombine.high %v963_v7, %v971_v9  ;;  %v937_v14 = vrot.slane %v920_v11, %v2709_v35 }
 0x398   : > { %v980_v15 = vrot.slane %v972_v12, %v2712_v39  ;;  %v987_v16 = vrot.slane %v973_v13, %v2712_v39  ;;  %v938_v17 = vcombine.low %v929_v10, %v937_v14  ;;  %v939_v18 = vcombine.high %v929_v10, %v937_v14 }
 0x39a   : > { %v988_v19 = vcombine.high %v980_v15, %v2391_v49  ;;  %v989_v20 = vcombine.high %v987_v16, %v2391_v49  ;;  %v946_v21 = vrot.slane %v938_v17, %v2712_v39  ;;  %v953_v22 = vrot.slane %v939_v18, %v2712_v39 }
 0x39b   : > { %v995_v23 = vshrl.u32 %v980_v15, 16  ;;  %v1011_v24 = vshrl.u32 %v987_v16, 16 }
 0x39c   : > { %v954_v25 = vcombine.high %v946_v21, %v2391_v49  ;;  %v955_v26 = vcombine.high %v953_v22, %v2391_v49  ;;  %v992_v27 = vpack.i.b16 %v980_v15, %v946_v21  ;;  %v994_v28 = vshrl.u32 %v946_v21, 16 }
 0x39d   : > { %v1003_v30 = vshrl.u32 %v988_v19, 16  ;;  %v1019_v31 = vshrl.u32 %v989_v20, 16  ;;  %v1008_v32 = vpack.i.b16 %v987_v16, %v953_v22  ;;  %v1010_v33 = vshrl.u32 %v953_v22, 16 }
 0x39e   : > { %v2138_v29 = vpop.eup %2137  ;;  %v996_v34 = vpack.i.b16 %v995_v23, %v994_v28  ;;  %v1000_v36 = vpack.i.b16 %v988_v19, %v954_v25  ;;  %v1002_v37 = vshrl.u32 %v954_v25, 16  ;;  %v1016_v38 = vpack.i.b16 %v989_v20, %v955_v26 }
 0x39f   : > { %v1012_v41 = vpack.i.b16 %v1011_v24, %v1010_v33  ;;  %v1018_v42 = vshrl.u32 %v955_v26, 16  ;;  %v1022_v43 = vcombine.low %v992_v27, %v1008_v32  ;;  %v1293_v44 = vsel %vm1084_vm2, %v2138_v29, 0.0 }
 0x3a0   : > { %v2140_v40 = vpop.eup %2139  ;;  %v1004_v45 = vpack.i.b16 %v1003_v30, %v1002_v37  ;;  %v1030_v46 = vcombine.low %v1000_v36, %v1016_v38  ;;  %1294 = vadd.xlane.f32.xlu0 %v1293_v44  ;;  %v1305_v10 = vpack.c.bf16 %v2138_v29, %v2138_v29 }
 0x3a1   : > { %v1296_v47 = vsel %vm1084_vm2, %v2140_v40, 0.0  ;;  %v1020_v48 = vpack.i.b16 %v1019_v31, %v1018_v42  ;;  %v1047_v50 = vcombine.low %v996_v34, %v1012_v41  ;;  %v1029_v51 = vrot.slane %v1022_v43, %v2709_v35 }
 0x3a2   : > { %1297 = vadd.xlane.f32.xlu1 %v1296_v47  ;;  %v1037_v52 = vrot.slane %v1030_v46, %v2709_v35  ;;  %v1306_v13 = vpack.c.bf16 %v2140_v40, %v2140_v40 }
 0x3a3   : > { %v1055_v54 = vcombine.low %v1004_v45, %v1020_v48  ;;  %v1054_v57 = vrot.slane %v1047_v50, %v2709_v35 }
 0x3a4   : > { %v1038_v55 = vcombine.low %v1029_v51, %v1037_v52 }
 0x3a5   : > { %v1062_v58 = vrot.slane %v1055_v54, %v2709_v35 }
 0x3a6   : > { %v1045_v59 = vrot.slane %v1038_v55, %v2712_v39 }
 0x3a7   : > { %v1063_v60 = vcombine.low %v1054_v57, %v1062_v58 }
 0x3a8   : > { %v1046_v61 = vcombine.high %v1045_v59, %v2391_v49  ;;  %v1075_v1 = vshrl.u32 %v1045_v59, 16 }
 0x3a9   : > { %v1070_v62 = vrot.slane %v1063_v60, %v2712_v39 }
 0x3aa   : > { %v1081_v4 = vshrl.u32 %v1046_v61, 16 }
 0x3ab   : > { %v1074_v63 = vpack.i.b16 %v1070_v62, %v1045_v59  ;;  %v1076_v2 = vshrl.u32 %v1070_v62, 16  ;;  %v1071_v3 = vcombine.high %v1070_v62, %v2391_v49 }
 0x3ad   : > { %v1314_v5 = vsel %vm1312_vm3, %v1074_v63, 0  ;;  %v1077_v6 = vpack.i.b16 %v1076_v2, %v1075_v1  ;;  %v1080_v7 = vpack.i.b16 %v1071_v3, %v1046_v61  ;;  %v1082_v8 = vshrl.u32 %v1071_v3, 16 }
 0x3ae   : > { %2006 = vmatpush3.bf16.msra.mxu1 %v1314_v5 }
 0x3af   : > { %v1360_v9 = vsel %vm1312_vm3, %v1077_v6, 0  ;;  %2017 = vmatprep.subr.bf16.mxu1 %v2384_v0  ;;  %v1083_v11 = vpack.i.b16 %v1082_v8, %v1081_v4  ;;  %v1406_v12 = vsel %vm1312_vm3, %v1080_v7, 0 }
 0x3b0   : > { %2012 = vmatpush3.bf16.msra.mxu0 %v1360_v9 }
 0x3b1   : > { %2008 = vmatmul.mubr.msk.bf16.vlgmr.msra.gmra.mrb[12].mxu1 %vm1084_vm2, %v1305_v10  ;;  %2023 = vmatprep.subr.bf16.mxu0 %v2384_v0  ;;  %v1452_v14 = vsel %vm1312_vm3, %v1083_v11, 0 }
 0x3b2   : > { %2018 = vmatpush3.bf16.msra.mxu1 %v1406_v12  ;;  %2019 = vmatprep.mubr.msk.bf16.mxu1 %vm2385_vm0, %v2384_v0 }
 0x3b3   : > { %2014 = vmatmul.mubr.msk.bf16.vlgmr.msra.gmra.mrb[16].mxu0 %vm1084_vm2, %v1306_v13  ;;  %2029 = vmatprep.subr.bf16.mxu1 %v2384_v0 }
 0x3b4   : > { %2024 = vmatpush3.bf16.msra.mxu0 %v1452_v14  ;;  %2025 = vmatprep.mubr.msk.bf16.mxu0 %vm2385_vm0, %v2384_v0 }
 0x3c4   : > { %v1280_v15 = vpop.xlane.xlu0 %1279 }
 0x3c5   : > { %v1284_v16 = vsub.f32 %v2778_v56, %v1280_v15 }
 0x3c6   : > { %v1277_v17 = vpop.xlane.xlu1 %1276 }
 0x3c7   : > { %v1291_v18 = vmul.f32 1.442695, %v1284_v16  ;;  %v1283_v19 = vsub.f32 %v2776_v53, %v1277_v17  ;;  %v2135_v53 = vld [vmem:[%s2913_s5] sm:$0xff]  }
 0x3c9   : > { %2141 = vpow2.f32 %v1291_v18  ;;  %v1289_v20 = vmul.f32 1.442695, %v1283_v19 }
 0x3cb   : > { %2143 = vpow2.f32 %v1289_v20 }
 0x3d3   : > { %v2142_v21 = vpop.eup %2141 }
 0x3d4   : > { %v1302_v22 = vsel %vm1084_vm2, %v2142_v21, 0.0  ;;  %v1308_v23 = vpack.c.bf16 %v2142_v21, %v2142_v21 }
 0x3d5   : > { %v2144_v24 = vpop.eup %2143  ;;  %1303 = vadd.xlane.f32.xlu1 %v1302_v22 }
 0x3d6   : > { %2026 = vmatmul.mubr.msk.bf16.vlgmr.msra.gmra.mrb[20].mxu0 %vm1084_vm2, %v1308_v23  ;;  %v1299_v25 = vsel %vm1084_vm2, %v2144_v24, 0.0  ;;  %v1307_v26 = vpack.c.bf16 %v2144_v24, %v2144_v24 }
 0x3d7   : > { %1300 = vadd.xlane.f32.xlu0 %v1299_v25 }
 0x3d8   : > { %2020 = vmatmul.mubr.msk.bf16.vlgmr.msra.gmra.mrb[16].mxu1 %vm1084_vm2, %v1307_v26 }
 0x3d9   : > { %2033 = vmatprep.mubr.msk.bf16.mxu1 %vm2385_vm0, %v2384_v0  ;;  %2030 = vmatpush3.bf16.msra.mxu1 %v2135_v53 }
 0x3da   : > { %2031 = vmatprep.subr.bf16.mxu1 %v2384_v0 }
 0x42d   : > { %v1295_v36 = vpop.xlane.xlu0 %1294 }
 0x42f   : > { %v1298_v34 = vpop.xlane.xlu1 %1297 }
 0x430   : > { %2145 = vrcp.f32 %v1298_v34 }
 0x431   : > { %2147 = vrcp.f32 %v1295_v36  ;;  %v2136_v36 = vld [vmem:[%s2913_s5 + $0x8] sm:$0xff]  }
 0x432   : > { %2032 = vmatpush3.bf16.msra.mxu1 %v2136_v36 }
 0x43a   : > { %v2146_v40 = vpop.eup %2145 }
 0x43b   : > { %v2148_v42 = vpop.eup %2147 }
 0x462   : > { %v1304_v37 = vpop.xlane.xlu1 %1303 }
 0x463   : > { %2149 = vrcp.f32 %v1304_v37 }
 0x464   : > { %v1301_v38 = vpop.xlane.xlu0 %1300 }
 0x465   : > { %2151 = vrcp.f32 %v1301_v38 }
 0x46d   : > { %v2150_v43 = vpop.eup %2149 }
 0x46f   : > { %v2152_v48 = vpop.eup %2151 }
 0x484   : > { %v1350_v56 = vpop.f32.mrb[12].mxu1 }
 0x485   : > { %v2009_v27 = vpop.f32.mrb[13].mxu1  ;;  %v1498_v0 = vmul.f32 %v2148_v42, %v1350_v56 }
 0x486   : > { %v1353_v28 = vpop.f32.mrb[14].mxu1  ;;  %v1396_v29 = vpop.f32.mrb[16].mxu0 }
 0x487   : > { %v2010_v30 = vpop.f32.mrb[15].mxu1  ;;  %v2015_v31 = vpop.f32.mrb[17].mxu0  ;;  %v1499_v41 = vmul.f32 %v2146_v40, %v1396_v29  ;;  %v1502_v52 = vpack.c.bf16 %v1498_v0, %v1498_v0 }
 0x488   : > { %v1399_v32 = vpop.f32.mrb[18].mxu0 }
 0x489   : > { %v2016_v33 = vpop.f32.mrb[19].mxu0  ;;  %v1536_v45 = vpack.c.bf16 %v1499_v41, %v1499_v41  ;;  %v1509_v1 = vrot.slane %v1502_v52, %v2709_v35 }
 0x48b   : > { %v1543_v60 = vrot.slane %v1536_v45, %v2709_v35 }
 0x4a9   : > { %v1488_v44 = vpop.f32.mrb[20].mxu0 }
 0x4aa   : > { %v1501_v46 = vmul.f32 %v2150_v43, %v1488_v44  ;;  %v2027_v47 = vpop.f32.mrb[21].mxu0 }
 0x4ab   : > { %v1442_v50 = vpop.f32.mrb[16].mxu1  ;;  %v1491_v51 = vpop.f32.mrb[22].mxu0 }
 0x4ac   : > { %v1544_v54 = vpack.c.bf16 %v1501_v46, %v1501_v46  ;;  %v1500_v55 = vmul.f32 %v2152_v48, %v1442_v50  ;;  %v2021_v57 = vpop.f32.mrb[17].mxu1  ;;  %v2028_v58 = vpop.f32.mrb[23].mxu0 }
 0x4ad   : > { %v1445_v59 = vpop.f32.mrb[18].mxu1 }
 0x4ae   : > { %v1551_v61 = vrot.slane %v1544_v54, %v2709_v35  ;;  %v1510_v62 = vpack.c.bf16 %v1500_v55, %v1500_v55  ;;  %v2022_v63 = vpop.f32.mrb[19].mxu1 }
 0x4b0   : > { %v1552_v2 = vcombine.low %v1543_v60, %v1551_v61  ;;  %v1553_v3 = vcombine.high %v1543_v60, %v1551_v61  ;;  %v1517_v4 = vrot.slane %v1510_v62, %v2709_v35 }
 0x4b2   : > { %v1560_v5 = vrot.slane %v1552_v2, %v2712_v39  ;;  %v1567_v6 = vrot.slane %v1553_v3, %v2712_v39  ;;  %v1518_v7 = vcombine.low %v1509_v1, %v1517_v4  ;;  %v1519_v8 = vcombine.high %v1509_v1, %v1517_v4 }
 0x4b4   : > { %v1568_v9 = vcombine.high %v1560_v5, %v2391_v49  ;;  %v1526_v10 = vrot.slane %v1518_v7, %v2712_v39  ;;  %v1533_v11 = vrot.slane %v1519_v8, %v2712_v39  ;;  %v1569_v12 = vcombine.high %v1567_v6, %v2391_v49 }
 0x4b5   : > { %v1575_v13 = vshrl.u32 %v1560_v5, 16  ;;  %v1591_v19 = vshrl.u32 %v1567_v6, 16 }
 0x4b6   : > { %v1534_v14 = vcombine.high %v1526_v10, %v2391_v49  ;;  %v1535_v15 = vcombine.high %v1533_v11, %v2391_v49  ;;  %v1572_v16 = vpack.i.b16 %v1560_v5, %v1526_v10  ;;  %v1574_v17 = vshrl.u32 %v1526_v10, 16 }
 0x4b7   : > { %v1583_v18 = vshrl.u32 %v1568_v9, 16  ;;  %v1588_v20 = vpack.i.b16 %v1567_v6, %v1533_v11  ;;  %v1590_v21 = vshrl.u32 %v1533_v11, 16  ;;  %v1599_v26 = vshrl.u32 %v1569_v12, 16 }
 0x4b8   : > { %v1576_v22 = vpack.i.b16 %v1575_v13, %v1574_v17  ;;  %v1580_v23 = vpack.i.b16 %v1568_v9, %v1534_v14  ;;  %v1582_v24 = vshrl.u32 %v1534_v14, 16  ;;  %v1596_v25 = vpack.i.b16 %v1569_v12, %v1535_v15 }
 0x4b9   : > { %v1592_v53 = vpack.i.b16 %v1591_v19, %v1590_v21  ;;  %v1598_v56 = vshrl.u32 %v1535_v15, 16  ;;  %v1602_v27 = vcombine.low %v1572_v16, %v1588_v20 }
 0x4ba   : > { %v1584_v28 = vpack.i.b16 %v1583_v18, %v1582_v24  ;;  %v1610_v29 = vcombine.low %v1580_v23, %v1596_v25 }
 0x4bb   : > { %v1600_v30 = vpack.i.b16 %v1599_v26, %v1598_v56  ;;  %v1627_v31 = vcombine.low %v1576_v22, %v1592_v53  ;;  %v1609_v32 = vrot.slane %v1602_v27, %v2709_v35 }
 0x4bc   : > { %v1617_v33 = vrot.slane %v1610_v29, %v2709_v35 }
 0x4bd   : > { %v1635_v34 = vcombine.low %v1584_v28, %v1600_v30  ;;  %v1634_v38 = vrot.slane %v1627_v31, %v2709_v35 }
 0x4be   : > { %v1618_v37 = vcombine.low %v1609_v32, %v1617_v33 }
 0x4bf   : > { %v1642_v40 = vrot.slane %v1635_v34, %v2709_v35 }
 0x4c0   : > { %v1625_v41 = vrot.slane %v1618_v37, %v2712_v39 }
 0x4c1   : > { %v1643_v42 = vcombine.low %v1634_v38, %v1642_v40 }
 0x4c2   : > { %v1626_v43 = vcombine.high %v1625_v41, %v2391_v49  ;;  %v1655_v44 = vshrl.u32 %v1625_v41, 16 }
 0x4c3   : > { %v1650_v0 = vrot.slane %v1643_v42, %v2712_v39 }
 0x4c4   : > { %v1661_v51 = vshrl.u32 %v1626_v43, 16 }
 0x4c5   : > { %v1656_v45 = vshrl.u32 %v1650_v0, 16  ;;  %v1651_v46 = vcombine.high %v1650_v0, %v2391_v49  ;;  %v1654_v47 = vpack.i.b16 %v1650_v0, %v1625_v41 }
 0x4c7   : > { %v1657_v48 = vpack.i.b16 %v1656_v45, %v1655_v44  ;;  %v1660_v50 = vpack.i.b16 %v1651_v46, %v1626_v43  ;;  %v1662_v52 = vshrl.u32 %v1651_v46, 16 }
 0x4c9   : > { %1664 = vrot.lane.b32.xlu0 %v1657_v48, %s2392_s10  ;;  %1666 = vrot.lane.b32.xlu1 %v1660_v50, %s2393_s19  ;;  %v1663_v35 = vpack.i.b16 %v1662_v52, %v1661_v51 }
 0x4cd   : > { %1668 = vrot.lane.b32.xlu1 %v1663_v35, %s2394_s16 }
 0x53b   : > { %v1665_v39 = vpop.permute.xlu0 %1664  ;;  %v1667_v54 = vpop.permute.xlu1 %1666 }
 0x53c   : > { %v1672_v55 = vsel %vm1084_vm2, %v1654_v47, %v1665_v39 }
 0x53d   : > { %v1675_v49 = vsel %vm1673_vm4, %v1672_v55, %v1667_v54 }
 0x53f   : > { %v1669_v57 = vpop.permute.xlu1 %1668 }
 0x540   : > { %v1678_v58 = vsel %vm1676_vm5, %v1675_v49, %v1669_v57 }
 0x541   : > { %2034 = vmatmul.mubr.msk.bf16.vlgmr.msra.gmra.mrb[20].mxu1 %vm393_vm1, %v1678_v58 }
 0x614   : > { %v1731_v59 = vpop.f32.mrb[20].mxu1 }
 0x615   : > { %1737 = vst.msk [vmem:[%s366_s11] sm:$0xff] %vm393_vm1, %v1731_v59  ;;  %v2035_v60 = vpop.f32.mrb[21].mxu1 }
 0x616   : > { %v1734_v61 = vpop.f32.mrb[22].mxu1 }
 0x617   : > { %2312 = shalt.err (!%p2309_p2)
}
 0x618   : > { %s2313_s15 = scalar_lea.hbm %s2863_s29, 128  ;;  %s2317_s9 = scalar_lea.hbm %s2914_s6, 256 }
 0x619   : > { %p2314_p5 = scmp.ne.s32.totalorder %s2863_s29, %s2313_s15  ;;  %p2318_p0 = scmp.lt.u32.totalorder %s2863_s29, %s2914_s6 }
 0x61a   : > { %p2319_p7 = scmp.lt.u32.totalorder %s2317_s9, %s2313_s15  ;;  %p2321_p6 = scmp.lt.u32.totalorder %s2313_s15, %s2863_s29 }
 0x61b   : > { %p2315_p12 = pnand %p2314_p5, %p2958_p10 }
 0x61c   : > { %p2320_p1 = por %p2319_p7, %p2318_p0 }
 0x61d   : > { %p2316_p3 = pneg %p2315_p12 }
 0x61e   : > { %p2322_p8 = por %p2321_p6, %p2320_p1 }
 0x620   : > { %p2323_p9 = pnand %p2322_p8, %p2316_p3 }
 0x622   : > { %2326 = shalt.err (!%p2323_p9)
}
 0x623   : > { %2051 = dma.vmem_to_hbm [thread:$0]  (%p2958_p10), %s2865_s18, 128, %s2863_s29, %s1739_s7   ;;  %v2036_v62 = vpop.f32.mrb[23].mxu1 }
 0x624 PF: > { %s2959_s20 = sld [smem:[#allocation17_spill]]  ;;  %s2960_s24 = sld [smem:[#allocation16_spill]] }
 0x625   : > { %s1764_s10 = sand.u32 1, %s2361_s21  }
 0x626   : > { %s1765_s19 = scalar_lea.sflag [#allocation4], %s1764_s10 }
 0x62a   : > { %p2961_p11 = scmp.ne.s32.totalorder %s2959_s20, 0  ;;  %p2962_p4 = scmp.ge.s32.totalorder %s2960_s24, 2 }
 0x62c   : > { %p2071_p13 = pnand %p2962_p4, %p2961_p11 }
 0x62e   : > { %2356 = dma.done.wait (!%p2071_p13), %s1765_s19, 128  }
 0x62f   : > { %2358 = vsyncadd (!%p2071_p13), %s1765_s19, 4294967168  ;;  %s2963_s24 = sld [smem:[#allocation18_spill]]  ;;  %s2964_s16 = sld [smem:[#allocation19_spill]] }
 0x630   : > { %s2965_s21 = smov %s2365_s22  ;;  %s2966_s22 = smov %s2369_s23 }
 0x635   : > { %p23_p2 = scmp.ge.s32.totalorder %s2963_s24, 4   ;;  %s2967_s23 = smov %s2964_s16 }
 0x637   :  { %25 = sbr.rel (!%p23_p2) target bundleno = 11 (0xb), region = 125 }
 0x63e   :  { %1770 = vsyncpa [#allocation3], 1 }
 0x63f   :  { %1772 = vsyncpa [#allocation3 + $0x1], 1 }
 0x640   :  { %1773 = vsyncpa [#allocation6], 1 }
 0x641   :  { %1775 = vsyncpa [#allocation6 + $0x1], 1 }
 0x642   :  { %1776 = vsyncpa [#allocation9], 1 }
 0x643   :  { %1777 = vsyncpa [#allocation4], 1 }
 0x644   :  { %1779 = vsyncpa [#allocation4 + $0x1], 1 }

</bundles_post_ra>
